<compile_context>
chip_gen: v5e
topology: v5e:2x2
jax: 0.10.0
libtpu: 0.0.40
codegen_flags: <defaults>
</compile_context>

<pallas_src>
import jax
import jax.numpy as jnp
from jax.experimental import pallas as pl
from jax.experimental.pallas import tpu as pltpu

_VMEM_LIMIT = 32 * 1024 * 1024  # safe scoped limit on v5e/v6e (128 MiB) and v7x (64 MiB)


def _round_up(x, m):
    return ((x + m - 1) // m) * m


# ----------------------------------------------------------------------------
# Kernel 1: fused  relu( X @ W + b )   (conv+BN+ReLU after BN fold, or fc)
# ----------------------------------------------------------------------------
def _matmul_bias_relu_kernel(x_ref, w_ref, b_ref, o_ref):
    acc = jnp.dot(x_ref[...], w_ref[...], preferred_element_type=jnp.float32)
    o_ref[...] = jnp.maximum(acc + b_ref[...], 0.0).astype(o_ref.dtype)


def matmul_bias_relu(x, w, bias, *, out_dtype=jnp.bfloat16, tm=512):
    """x: [M, K] bf16, w: [K, N] bf16, bias: [1, N] f32 -> [M, N] out_dtype."""
    M, K = x.shape
    K2, N = w.shape
    assert K == K2
    TM = min(tm, _round_up(M, 8))
    M_pad = _round_up(M, TM)
    if M_pad != M:
        x = jnp.pad(x, ((0, M_pad - M), (0, 0)))
    out = pl.pallas_call(
        _matmul_bias_relu_kernel,
        out_shape=jax.ShapeDtypeStruct((M_pad, N), out_dtype),
        grid=(M_pad // TM,),
        in_specs=[
            pl.BlockSpec((TM, K), lambda i: (i, 0)),
            pl.BlockSpec((K, N), lambda i: (0, 0)),
            pl.BlockSpec((1, N), lambda i: (0, 0)),
        ],
        out_specs=pl.BlockSpec((TM, N), lambda i: (i, 0)),
        compiler_params=pltpu.CompilerParams(
            dimension_semantics=("parallel",),
            vmem_limit_bytes=_VMEM_LIMIT),
    )(x, w, bias)
    return out[:M] if M_pad != M else out


# ----------------------------------------------------------------------------
# Kernel 2: fused tail  conv3 -> BN/ReLU -> fc1 -> ReLU -> head(512->1)
# (head is a VPU multiply + lane reduction; intermediates never leave VMEM)
# ----------------------------------------------------------------------------
def _tail_kernel(p3_ref, w3_ref, b3_ref, w1_ref, b1_ref, wh_ref, bh_ref, o_ref):
    c3 = jnp.dot(p3_ref[...], w3_ref[...], preferred_element_type=jnp.float32)
    c3 = jnp.maximum(c3 + b3_ref[...], 0.0)                       # conv3+BN+ReLU
    h = jnp.dot(c3.astype(jnp.bfloat16), w1_ref[...],
                preferred_element_type=jnp.float32)
    h = jnp.maximum(h + b1_ref[...], 0.0)                         # fc1+ReLU
    y = jnp.sum(h * wh_ref[...], axis=-1, keepdims=True) + bh_ref[...]  # head
    o_ref[...] = y.astype(o_ref.dtype)


def tail_fused(p3, w3, b3, w1, b1, wh, bh, *, tb=512):
    M, K3 = p3.shape
    N3 = w3.shape[1]
    H1 = w1.shape[1]
    TB = min(tb, _round_up(M, 8))
    M_pad = _round_up(M, TB)
    if M_pad != M:
        p3 = jnp.pad(p3, ((0, M_pad - M), (0, 0)))
    out = pl.pallas_call(
        _tail_kernel,
        out_shape=jax.ShapeDtypeStruct((M_pad, 1), jnp.float32),
        grid=(M_pad // TB,),
        in_specs=[
            pl.BlockSpec((TB, K3), lambda i: (i, 0)),
            pl.BlockSpec((K3, N3), lambda i: (0, 0)),
            pl.BlockSpec((1, N3), lambda i: (0, 0)),
            pl.BlockSpec((N3, H1), lambda i: (0, 0)),
            pl.BlockSpec((1, H1), lambda i: (0, 0)),
            pl.BlockSpec((1, H1), lambda i: (0, 0)),
            pl.BlockSpec((1, 1), lambda i: (0, 0)),
        ],
        out_specs=pl.BlockSpec((TB, 1), lambda i: (i, 0)),
        compiler_params=pltpu.CompilerParams(
            dimension_semantics=("parallel",),
            vmem_limit_bytes=_VMEM_LIMIT),
    )(p3, w3, b3, w1, b1, wh, bh)
    return out[:M] if M_pad != M else out


# ----------------------------------------------------------------------------
# Kernel 3: fused fc1 -> ReLU -> head   (fallback when conv3 output is not 1x1)
# ----------------------------------------------------------------------------
def _fc1_head_kernel(x_ref, w1_ref, b1_ref, wh_ref, bh_ref, o_ref):
    h = jnp.dot(x_ref[...], w1_ref[...], preferred_element_type=jnp.float32)
    h = jnp.maximum(h + b1_ref[...], 0.0)
    y = jnp.sum(h * wh_ref[...], axis=-1, keepdims=True) + bh_ref[...]
    o_ref[...] = y.astype(o_ref.dtype)


def fc1_head(x, w1, b1, wh, bh, *, tb=512):
    M, K = x.shape
    H1 = w1.shape[1]
    TB = min(tb, _round_up(M, 8))
    M_pad = _round_up(M, TB)
    if M_pad != M:
        x = jnp.pad(x, ((0, M_pad - M), (0, 0)))
    out = pl.pallas_call(
        _fc1_head_kernel,
        out_shape=jax.ShapeDtypeStruct((M_pad, 1), jnp.float32),
        grid=(M_pad // TB,),
        in_specs=[
            pl.BlockSpec((TB, K), lambda i: (i, 0)),
            pl.BlockSpec((K, H1), lambda i: (0, 0)),
            pl.BlockSpec((1, H1), lambda i: (0, 0)),
            pl.BlockSpec((1, H1), lambda i: (0, 0)),
            pl.BlockSpec((1, 1), lambda i: (0, 0)),
        ],
        out_specs=pl.BlockSpec((TB, 1), lambda i: (i, 0)),
        compiler_params=pltpu.CompilerParams(
            dimension_semantics=("parallel",),
            vmem_limit_bytes=_VMEM_LIMIT),
    )(x, w1, b1, wh, bh)
    return out[:M] if M_pad != M else out


# ----------------------------------------------------------------------------
# im2col glue (pure data movement, bf16; patch feature order = (kh, kw, c_in))
# ----------------------------------------------------------------------------
def im2col(x_nhwc, kh, kw, stride):
    B, H, W, C = x_nhwc.shape
    OH = (H - kh) // stride + 1
    OW = (W - kw) // stride + 1
    patches = []
    for i in range(kh):
        for j in range(kw):
            patches.append(
                x_nhwc[:, i:i + stride * OH:stride, j:j + stride * OW:stride, :])
    p = jnp.stack(patches, axis=3)                       # [B, OH, OW, KH*KW, C]
    return p.reshape(B * OH * OW, kh * kw * C), (B, OH, OW)


# ----------------------------------------------------------------------------
# Parameter construction + one-time re-layout / BN fold / bf16 cast
# ----------------------------------------------------------------------------
def conv_size_out(size, k, s):
    return (size - (k - 1) - 1) // s + 1


def init_params(key, h, w, window_size=4):
    keys = jax.random.split(key, 16)

    def nrm(k, shape, scale=0.05):
        return scale * jax.random.normal(k, shape, jnp.float32)

    params = {}
    params["conv1_w"] = nrm(keys[0], (32, window_size, 8, 8))   # torch layout
    params["conv1_b"] = nrm(keys[1], (32,))
    params["conv2_w"] = nrm(keys[2], (64, 32, 4, 4))
    params["conv2_b"] = nrm(keys[3], (64,))
    params["conv3_w"] = nrm(keys[4], (64, 64, 3, 3))
    params["conv3_b"] = nrm(keys[5], (64,))

    def bn_params(kg, kb, km, c):
        gamma = 1.0 + 0.1 * jax.random.normal(kg, (c,), jnp.float32)
        beta = 0.05 * jax.random.normal(kb, (c,), jnp.float32)
        mean = 0.05 * jax.random.normal(km, (c,), jnp.float32)
        var = jnp.ones((c,), jnp.float32)
        return (gamma, beta, mean, var, 1e-5)

    params["bn1"] = bn_params(keys[6], keys[7], keys[8], 32)
    params["bn2"] = bn_params(keys[9], keys[10], keys[11], 64)
    params["bn3"] = bn_params(keys[12], keys[13], keys[14], 64)

    convw = conv_size_out(conv_size_out(conv_size_out(w, 8, 4), 4, 2), 3, 1)
    convh = conv_size_out(conv_size_out(conv_size_out(h, 8, 4), 4, 2), 3, 1)
    lin_in = convw * convh * 64

    k_fc = jax.random.split(keys[15], 4)
    params["fc1_w_t"] = nrm(k_fc[0], (lin_in, 512))    # stored as [K, N]
    params["fc1_b"] = nrm(k_fc[1], (512,))
    params["head_w_t"] = nrm(k_fc[2], (512, 1))        # ConvV2Model head: 512 -> 1
    params["head_b"] = nrm(k_fc[3], (1,))
    return params


def prepare_params(raw):
    """One-time: fold eval-BN into weights/bias, re-layout, cast to bf16."""
    def conv_pack(w, b, bn):
        C_out, C_in, KH, KW = w.shape
        gamma, beta, mean, var, eps = bn
        scale = gamma / jnp.sqrt(var + eps)                          # [C_out]
        w_mat = jnp.transpose(w, (2, 3, 1, 0)).reshape(KH * KW * C_in, C_out)
        w_eff = (w_mat * scale[None, :]).astype(jnp.bfloat16)        # BN scale folded
        bias = (beta + (b - mean) * scale).reshape(1, C_out).astype(jnp.float32)
        return w_eff, bias

    p = {}
    p["c1_w"], p["c1_b"] = conv_pack(raw["conv1_w"], raw["conv1_b"], raw["bn1"])
    p["c2_w"], p["c2_b"] = conv_pack(raw["conv2_w"], raw["conv2_b"], raw["bn2"])
    p["c3_w"], p["c3_b"] = conv_pack(raw["conv3_w"], raw["conv3_b"], raw["bn3"])
    p["fc1_w"] = raw["fc1_w_t"].astype(jnp.bfloat16)                 # [lin_in, 512]
    p["fc1_b"] = raw["fc1_b"].reshape(1, -1).astype(jnp.float32)
    p["head_w"] = raw["head_w_t"].reshape(1, -1).astype(jnp.float32)  # [1, 512]
    p["head_b"] = raw["head_b"].reshape(1, 1).astype(jnp.float32)
    return p


# ----------------------------------------------------------------------------
# Forward pass (matches ConvV2Model.forward, eval-mode BatchNorm)
# ----------------------------------------------------------------------------
def conv_v2_forward(p, x_nchw):
    if x_nchw.ndim == 3:
        x_nchw = x_nchw[None]
    x = x_nchw.astype(jnp.float32) / 255.0
    x = jnp.transpose(x, (0, 2, 3, 1)).astype(jnp.bfloat16)          # NCHW -> NHWC bf16

    # conv1 (k8 s4) + BN + ReLU
    patches, (B, OH, OW) = im2col(x, 8, 8, 4)
    x = matmul_bias_relu(patches, p["c1_w"], p["c1_b"]).reshape(B, OH, OW, -1)
    # conv2 (k4 s2) + BN + ReLU
    patches, (B, OH, OW) = im2col(x, 4, 4, 2)
    x = matmul_bias_relu(patches, p["c2_w"], p["c2_b"]).reshape(B, OH, OW, -1)

    # conv3 (k3 s1) + BN + ReLU -> fc1 + ReLU -> head (512 -> 1)
    patches3, (B, OH3, OW3) = im2col(x, 3, 3, 1)
    if OH3 * OW3 == 1:
        # fully fused tail: intermediates stay in VMEM, head is a lane reduction
        y = tail_fused(patches3, p["c3_w"], p["c3_b"],
                       p["fc1_w"], p["fc1_b"], p["head_w"], p["head_b"])
    else:
        c3 = matmul_bias_relu(patches3, p["c3_w"], p["c3_b"]).reshape(B, OH3, OW3, -1)
        # torch flattens NCHW: transpose so flatten order is (C, H, W)
        flat = jnp.transpose(c3, (0, 3, 1, 2)).reshape(B, -1)
        y = fc1_head(flat, p["fc1_w"], p["fc1_b"], p["head_w"], p["head_b"])
    return y                                                          # [B, 1] f32


if __name__ == "__main__":
    # Smallest valid spatial size through the conv stack: 36 -> 8 -> 3 -> 1.
    B, C, H, W = 2, 4, 36, 36
    key = jax.random.PRNGKey(0)
    k_param, k_x = jax.random.split(key)

    raw = init_params(k_param, H, W, window_size=C)
    params = prepare_params(raw)      # one-time re-layout / BN fold / bf16 cast
    x = jax.random.randint(k_x, (B, C, H, W), 0, 256, jnp.int32).astype(jnp.uint8)

    out = jax.jit(conv_v2_forward)(params, x)
    out = jax.block_until_ready(out)
    assert out.shape == (B, 1) and out.dtype == jnp.float32
    assert bool(jnp.all(jnp.isfinite(out)))
    print("KERNEL_OK")
</pallas_src>

<mosaic_0001>
module attributes {stable_mosaic.version = 11 : i64} {
  func.func @_matmul_bias_relu_kernel(%arg0: i32, %arg1: memref<128x256xbf16, #tpu.memory_space<vmem>>, %arg2: memref<256x32xbf16, #tpu.memory_space<vmem>>, %arg3: memref<1x32xf32, #tpu.memory_space<vmem>>, %arg4: memref<128x32xbf16, #tpu.memory_space<vmem>>) attributes {dimension_semantics = [#tpu.dimension_semantics<parallel>], iteration_bounds = array<i64: 1>, scalar_prefetch = 0 : i64, scratch_operands = 0 : i64, tpu.core_type = #tpu.core_type<tc>, window_params = [{transform_indices = @transform_0, window_bounds = array<i64: 128, 256>}, {pipeline_mode = #tpu.pipeline_mode<synchronous>, transform_indices = @transform_1, window_bounds = array<i64: 256, 32>}, {pipeline_mode = #tpu.pipeline_mode<synchronous>, transform_indices = @transform_2, window_bounds = array<i64: 1, 32>}, {transform_indices = @transform_3, window_bounds = array<i64: 128, 32>}]} {
    %c0 = arith.constant 0 : index
    %c0_0 = arith.constant 0 : index
    %0 = vector.load %arg1[%c0, %c0_0] : memref<128x256xbf16, #tpu.memory_space<vmem>>, vector<128x256xbf16>
    %c0_1 = arith.constant 0 : index
    %c0_2 = arith.constant 0 : index
    %1 = vector.load %arg2[%c0_1, %c0_2] : memref<256x32xbf16, #tpu.memory_space<vmem>>, vector<256x32xbf16>
    %cst = arith.constant dense<0.000000e+00> : vector<128x32xf32>
    %2 = tpu.matmul %0, %1, %cst {dimension_numbers = #tpu.dot_dimension_numbers<[1], [0], [0], [1], [0, 0, 1, 1], [], []>} : vector<128x256xbf16>, vector<256x32xbf16>, vector<128x32xf32> -> vector<128x32xf32>
    %c0_3 = arith.constant 0 : index
    %c0_4 = arith.constant 0 : index
    %3 = vector.load %arg3[%c0_3, %c0_4] : memref<1x32xf32, #tpu.memory_space<vmem>>, vector<1x32xf32>
    %4 = vector.broadcast %3 : vector<1x32xf32> to vector<128x32xf32>
    %5 = arith.addf %2, %4 : vector<128x32xf32>
    %cst_5 = arith.constant 0.000000e+00 : f32
    %6 = vector.broadcast %cst_5 : f32 to vector<128x32xf32>
    %7 = arith.maximumf %5, %6 : vector<128x32xf32>
    %8 = arith.truncf %7 : vector<128x32xf32> to vector<128x32xbf16>
    %c0_6 = arith.constant 0 : index
    %c0_7 = arith.constant 0 : index
    %9 = vector.load %arg4[%c0_6, %c0_7] : memref<128x32xbf16, #tpu.memory_space<vmem>>, vector<128x32xbf16>
    tpu.vector_store %arg4[%c0_6, %c0_7], %8 {strides = array<i32>} : memref<128x32xbf16, #tpu.memory_space<vmem>>, vector<128x32xbf16>,
    return
  }
  func.func @transform_0(%arg0: i32) -> (i32, i32) {
    %c0_i32 = arith.constant 0 : i32
    %c0_i32_0 = arith.constant 0 : i32
    return %arg0, %c0_i32 : i32, i32
  }
  func.func @transform_1(%arg0: i32) -> (i32, i32) {
    %c0_i32 = arith.constant 0 : i32
    %c0_i32_0 = arith.constant 0 : i32
    %c0_i32_1 = arith.constant 0 : i32
    return %c0_i32, %c0_i32_0 : i32, i32
  }
  func.func @transform_2(%arg0: i32) -> (i32, i32) {
    %c0_i32 = arith.constant 0 : i32
    %c0_i32_0 = arith.constant 0 : i32
    %c0_i32_1 = arith.constant 0 : i32
    return %c0_i32, %c0_i32_0 : i32, i32
  }
  func.func @transform_3(%arg0: i32) -> (i32, i32) {
    %c0_i32 = arith.constant 0 : i32
    %c0_i32_0 = arith.constant 0 : i32
    return %arg0, %c0_i32 : i32, i32
  }
}

module attributes {stable_mosaic.version = 11 : i64} {
  func.func @_matmul_bias_relu_kernel(%arg0: i32, %arg1: memref<24x512xbf16, #tpu.memory_space<vmem>>, %arg2: memref<512x64xbf16, #tpu.memory_space<vmem>>, %arg3: memref<1x64xf32, #tpu.memory_space<vmem>>, %arg4: memref<24x64xbf16, #tpu.memory_space<vmem>>) attributes {dimension_semantics = [#tpu.dimension_semantics<parallel>], iteration_bounds = array<i64: 1>, scalar_prefetch = 0 : i64, scratch_operands = 0 : i64, tpu.core_type = #tpu.core_type<tc>, window_params = [{transform_indices = @transform_0, window_bounds = array<i64: 24, 512>}, {pipeline_mode = #tpu.pipeline_mode<synchronous>, transform_indices = @transform_1, window_bounds = array<i64: 512, 64>}, {pipeline_mode = #tpu.pipeline_mode<synchronous>, transform_indices = @transform_2, window_bounds = array<i64: 1, 64>}, {transform_indices = @transform_3, window_bounds = array<i64: 24, 64>}]} {
    %c0 = arith.constant 0 : index
    %c0_0 = arith.constant 0 : index
    %0 = vector.load %arg1[%c0, %c0_0] : memref<24x512xbf16, #tpu.memory_space<vmem>>, vector<24x512xbf16>
    %c0_1 = arith.constant 0 : index
    %c0_2 = arith.constant 0 : index
    %1 = vector.load %arg2[%c0_1, %c0_2] : memref<512x64xbf16, #tpu.memory_space<vmem>>, vector<512x64xbf16>
    %cst = arith.constant dense<0.000000e+00> : vector<24x64xf32>
    %2 = tpu.matmul %0, %1, %cst {dimension_numbers = #tpu.dot_dimension_numbers<[1], [0], [0], [1], [0, 0, 1, 1], [], []>} : vector<24x512xbf16>, vector<512x64xbf16>, vector<24x64xf32> -> vector<24x64xf32>
    %c0_3 = arith.constant 0 : index
    %c0_4 = arith.constant 0 : index
    %3 = vector.load %arg3[%c0_3, %c0_4] : memref<1x64xf32, #tpu.memory_space<vmem>>, vector<1x64xf32>
    %4 = vector.broadcast %3 : vector<1x64xf32> to vector<24x64xf32>
    %5 = arith.addf %2, %4 : vector<24x64xf32>
    %cst_5 = arith.constant 0.000000e+00 : f32
    %6 = vector.broadcast %cst_5 : f32 to vector<24x64xf32>
    %7 = arith.maximumf %5, %6 : vector<24x64xf32>
    %8 = arith.truncf %7 : vector<24x64xf32> to vector<24x64xbf16>
    %c0_6 = arith.constant 0 : index
    %c0_7 = arith.constant 0 : index
    %9 = vector.load %arg4[%c0_6, %c0_7] : memref<24x64xbf16, #tpu.memory_space<vmem>>, vector<24x64xbf16>
    tpu.vector_store %arg4[%c0_6, %c0_7], %8 {strides = array<i32>} : memref<24x64xbf16, #tpu.memory_space<vmem>>, vector<24x64xbf16>,
    return
  }
  func.func @transform_0(%arg0: i32) -> (i32, i32) {
    %c0_i32 = arith.constant 0 : i32
    %c0_i32_0 = arith.constant 0 : i32
    return %arg0, %c0_i32 : i32, i32
  }
  func.func @transform_1(%arg0: i32) -> (i32, i32) {
    %c0_i32 = arith.constant 0 : i32
    %c0_i32_0 = arith.constant 0 : i32
    %c0_i32_1 = arith.constant 0 : i32
    return %c0_i32, %c0_i32_0 : i32, i32
  }
  func.func @transform_2(%arg0: i32) -> (i32, i32) {
    %c0_i32 = arith.constant 0 : i32
    %c0_i32_0 = arith.constant 0 : i32
    %c0_i32_1 = arith.constant 0 : i32
    return %c0_i32, %c0_i32_0 : i32, i32
  }
  func.func @transform_3(%arg0: i32) -> (i32, i32) {
    %c0_i32 = arith.constant 0 : i32
    %c0_i32_0 = arith.constant 0 : i32
    return %arg0, %c0_i32 : i32, i32
  }
}

module attributes {stable_mosaic.version = 11 : i64} {
  func.func @_tail_kernel(%arg0: i32, %arg1: memref<8x576xbf16, #tpu.memory_space<vmem>>, %arg2: memref<576x64xbf16, #tpu.memory_space<vmem>>, %arg3: memref<1x64xf32, #tpu.memory_space<vmem>>, %arg4: memref<64x512xbf16, #tpu.memory_space<vmem>>, %arg5: memref<1x512xf32, #tpu.memory_space<vmem>>, %arg6: memref<1x512xf32, #tpu.memory_space<vmem>>, %arg7: memref<1x1xf32, #tpu.memory_space<vmem>>, %arg8: memref<8x1xf32, #tpu.memory_space<vmem>>) attributes {dimension_semantics = [#tpu.dimension_semantics<parallel>], iteration_bounds = array<i64: 1>, scalar_prefetch = 0 : i64, scratch_operands = 0 : i64, tpu.core_type = #tpu.core_type<tc>, window_params = [{transform_indices = @transform_0, window_bounds = array<i64: 8, 576>}, {pipeline_mode = #tpu.pipeline_mode<synchronous>, transform_indices = @transform_1, window_bounds = array<i64: 576, 64>}, {pipeline_mode = #tpu.pipeline_mode<synchronous>, transform_indices = @transform_2, window_bounds = array<i64: 1, 64>}, {pipeline_mode = #tpu.pipeline_mode<synchronous>, transform_indices = @transform_3, window_bounds = array<i64: 64, 512>}, {pipeline_mode = #tpu.pipeline_mode<synchronous>, transform_indices = @transform_4, window_bounds = array<i64: 1, 512>}, {pipeline_mode = #tpu.pipeline_mode<synchronous>, transform_indices = @transform_5, window_bounds = array<i64: 1, 512>}, {pipeline_mode = #tpu.pipeline_mode<synchronous>, transform_indices = @transform_6, window_bounds = array<i64: 1, 1>}, {transform_indices = @transform_7, window_bounds = array<i64: 8, 1>}]} {
    %c0 = arith.constant 0 : index
    %c0_0 = arith.constant 0 : index
    %0 = vector.load %arg1[%c0, %c0_0] : memref<8x576xbf16, #tpu.memory_space<vmem>>, vector<8x576xbf16>
    %c0_1 = arith.constant 0 : index
    %c0_2 = arith.constant 0 : index
    %1 = vector.load %arg2[%c0_1, %c0_2] : memref<576x64xbf16, #tpu.memory_space<vmem>>, vector<576x64xbf16>
    %cst = arith.constant dense<0.000000e+00> : vector<8x64xf32>
    %2 = tpu.matmul %0, %1, %cst {dimension_numbers = #tpu.dot_dimension_numbers<[1], [0], [0], [1], [0, 0, 1, 1], [], []>} : vector<8x576xbf16>, vector<576x64xbf16>, vector<8x64xf32> -> vector<8x64xf32>
    %c0_3 = arith.constant 0 : index
    %c0_4 = arith.constant 0 : index
    %3 = vector.load %arg3[%c0_3, %c0_4] : memref<1x64xf32, #tpu.memory_space<vmem>>, vector<1x64xf32>
    %4 = vector.broadcast %3 : vector<1x64xf32> to vector<8x64xf32>
    %5 = arith.addf %2, %4 : vector<8x64xf32>
    %cst_5 = arith.constant 0.000000e+00 : f32
    %6 = vector.broadcast %cst_5 : f32 to vector<8x64xf32>
    %7 = arith.maximumf %5, %6 : vector<8x64xf32>
    %8 = arith.truncf %7 : vector<8x64xf32> to vector<8x64xbf16>
    %c0_6 = arith.constant 0 : index
    %c0_7 = arith.constant 0 : index
    %9 = vector.load %arg4[%c0_6, %c0_7] : memref<64x512xbf16, #tpu.memory_space<vmem>>, vector<64x512xbf16>
    %cst_8 = arith.constant dense<0.000000e+00> : vector<8x512xf32>
    %10 = tpu.matmul %8, %9, %cst_8 {dimension_numbers = #tpu.dot_dimension_numbers<[1], [0], [0], [1], [0, 0, 1, 1], [], []>} : vector<8x64xbf16>, vector<64x512xbf16>, vector<8x512xf32> -> vector<8x512xf32>
    %c0_9 = arith.constant 0 : index
    %c0_10 = arith.constant 0 : index
    %11 = vector.load %arg5[%c0_9, %c0_10] : memref<1x512xf32, #tpu.memory_space<vmem>>, vector<1x512xf32>
    %12 = vector.broadcast %11 : vector<1x512xf32> to vector<8x512xf32>
    %13 = arith.addf %10, %12 : vector<8x512xf32>
    %cst_11 = arith.constant 0.000000e+00 : f32
    %14 = vector.broadcast %cst_11 : f32 to vector<8x512xf32>
    %15 = arith.maximumf %13, %14 : vector<8x512xf32>
    %c0_12 = arith.constant 0 : index
    %c0_13 = arith.constant 0 : index
    %16 = vector.load %arg6[%c0_12, %c0_13] : memref<1x512xf32, #tpu.memory_space<vmem>>, vector<1x512xf32>
    %17 = vector.broadcast %16 : vector<1x512xf32> to vector<8x512xf32>
    %18 = arith.mulf %15, %17 : vector<8x512xf32>
    %cst_14 = arith.constant dense<0.000000e+00> : vector<8xf32>
    %19 = vector.multi_reduction <add>, %18, %cst_14 [1] : vector<8x512xf32> to vector<8xf32>
    %20 = vector.shape_cast %19 : vector<8xf32> to vector<8x1xf32>
    %c0_15 = arith.constant 0 : index
    %c0_16 = arith.constant 0 : index
    %21 = vector.load %arg7[%c0_15, %c0_16] : memref<1x1xf32, #tpu.memory_space<vmem>>, vector<1x1xf32>
    %22 = vector.broadcast %21 : vector<1x1xf32> to vector<8x1xf32>
    %23 = arith.addf %20, %22 : vector<8x1xf32>
    %c0_17 = arith.constant 0 : index
    %c0_18 = arith.constant 0 : index
    %24 = vector.load %arg8[%c0_17, %c0_18] : memref<8x1xf32, #tpu.memory_space<vmem>>, vector<8x1xf32>
    tpu.vector_store %arg8[%c0_17, %c0_18], %23 {strides = array<i32>} : memref<8x1xf32, #tpu.memory_space<vmem>>, vector<8x1xf32>,
    return
  }
  func.func @transform_0(%arg0: i32) -> (i32, i32) {
    %c0_i32 = arith.constant 0 : i32
    %c0_i32_0 = arith.constant 0 : i32
    return %arg0, %c0_i32 : i32, i32
  }
  func.func @transform_1(%arg0: i32) -> (i32, i32) {
    %c0_i32 = arith.constant 0 : i32
    %c0_i32_0 = arith.constant 0 : i32
    %c0_i32_1 = arith.constant 0 : i32
    return %c0_i32, %c0_i32_0 : i32, i32
  }
  func.func @transform_2(%arg0: i32) -> (i32, i32) {
    %c0_i32 = arith.constant 0 : i32
    %c0_i32_0 = arith.constant 0 : i32
    %c0_i32_1 = arith.constant 0 : i32
    return %c0_i32, %c0_i32_0 : i32, i32
  }
  func.func @transform_3(%arg0: i32) -> (i32, i32) {
    %c0_i32 = arith.constant 0 : i32
    %c0_i32_0 = arith.constant 0 : i32
    %c0_i32_1 = arith.constant 0 : i32
    return %c0_i32, %c0_i32_0 : i32, i32
  }
  func.func @transform_4(%arg0: i32) -> (i32, i32) {
    %c0_i32 = arith.constant 0 : i32
    %c0_i32_0 = arith.constant 0 : i32
    %c0_i32_1 = arith.constant 0 : i32
    return %c0_i32, %c0_i32_0 : i32, i32
  }
  func.func @transform_5(%arg0: i32) -> (i32, i32) {
    %c0_i32 = arith.constant 0 : i32
    %c0_i32_0 = arith.constant 0 : i32
    %c0_i32_1 = arith.constant 0 : i32
    return %c0_i32, %c0_i32_0 : i32, i32
  }
  func.func @transform_6(%arg0: i32) -> (i32, i32) {
    %c0_i32 = arith.constant 0 : i32
    %c0_i32_0 = arith.constant 0 : i32
    %c0_i32_1 = arith.constant 0 : i32
    return %c0_i32, %c0_i32_0 : i32, i32
  }
  func.func @transform_7(%arg0: i32) -> (i32, i32) {
    %c0_i32 = arith.constant 0 : i32
    %c0_i32_0 = arith.constant 0 : i32
    return %arg0, %c0_i32 : i32, i32
  }
}

</mosaic_0001>

<bundles_post_ra>
// kernel: conv_v2_forward.3
= control target key start
LH: loop header
LB: loop body
LE: loop exit
PB: predicated region body
PF: predicated region fallthrough
CT: control target
= control target key end

     0   :  { %vm372_vm0 = vcmask 257024   ;;  %s819_s1 = inlined_call_operand.vmem [shape: bf16[256,32], index: 1, kind: input, shape index: {}]   ;;  %s820_s2 = inlined_call_operand.vmem [shape: f32[1,32], index: 2, kind: input, shape index: {}]   ;;  %s821_s0 = inlined_call_operand.vmem [shape: bf16[128,256], index: 0, kind: input, shape index: {}]   ;;  %s822_s3 = inlined_call_operand.vmem [shape: bf16[128,32], index: 3, kind: output, shape index: {}]  }
   0x1   :  { %v544_v0 = vld [vmem:[%s819_s1 + $0x38] sm:$0xff]  ;;  %v543_v2 = vld [vmem:[%s819_s1 + $0x30] sm:$0xff]  ;;  %v542_v4 = vld [vmem:[%s819_s1 + $0x28] sm:$0xff] }
   0x2   :  { %v552_v1 = vld [vmem:[%s819_s1 + $0x78] sm:$0xff]  ;;  %242 = vmatpush.bf16.msra.mxu0 %v544_v0  ;;  %553 = vmatpush.bf16.msra.mxu2 %v544_v0  ;;  %v551_v3 = vld [vmem:[%s819_s1 + $0x70] sm:$0xff]  ;;  %v550_v5 = vld [vmem:[%s819_s1 + $0x68] sm:$0xff] }
   0x3   :  { %291 = vmatpush.bf16.msra.mxu1 %v552_v1  ;;  %561 = vmatpush.bf16.msra.mxu3 %v552_v1  ;;  %v541_v6 = vld [vmem:[%s819_s1 + $0x20] sm:$0xff]  ;;  %v540_v8 = vld [vmem:[%s819_s1 + $0x18] sm:$0xff]  ;;  %v539_v10 = vld [vmem:[%s819_s1 + $0x10] sm:$0xff] }
   0x4   :  { %v549_v7 = vld [vmem:[%s819_s1 + $0x60] sm:$0xff]  ;;  %v548_v9 = vld [vmem:[%s819_s1 + $0x58] sm:$0xff]  ;;  %v547_v11 = vld [vmem:[%s819_s1 + $0x50] sm:$0xff] }
   0x5   :  { %v538_v12 = vld [vmem:[%s819_s1 + $0x8] sm:$0xff]  ;;  %v537_v14 = vld [vmem:[%s819_s1] sm:$0xff]  ;;  %v403_v28 = vld [vmem:[%s821_s0 + $0x10] sm:$0xf] }
   0x6   :  { %243 = vmatpush.bf16.msra.mxu0 %v543_v2  ;;  %554 = vmatpush.bf16.msra.mxu2 %v543_v2  ;;  %v546_v13 = vld [vmem:[%s819_s1 + $0x48] sm:$0xff]  ;;  %v545_v15 = vld [vmem:[%s819_s1 + $0x40] sm:$0xff]  ;;  %v524_v29 = vld [vmem:[%s821_s0 + $0x14] sm:$0xf0] }
   0x7   :  { %292 = vmatpush.bf16.msra.mxu1 %v551_v3  ;;  %562 = vmatpush.bf16.msra.mxu3 %v551_v3  ;;  %v395_v16 = vld [vmem:[%s821_s0] sm:$0xf]  ;;  %v522_v17 = vld [vmem:[%s821_s0 + $0x4] sm:$0xf0]  ;;  %v521_v20 = vld [vmem:[%s821_s0 + $0x4] sm:$0xf]  ;;  %v404_v36 = vor.u32 %v524_v29, %v403_v28 }
   0x8   :  { %v427_v18 = vld [vmem:[%s821_s0 + $0x40] sm:$0xf]  ;;  %v530_v19 = vld [vmem:[%s821_s0 + $0x44] sm:$0xf0]  ;;  %v397_v21 = vld [vmem:[%s821_s0 + $0x8] sm:$0xf0]  ;;  %v396_v24 = vor.u32 %v522_v17, %v395_v16 }
   0x9   :  { %v529_v22 = vld [vmem:[%s821_s0 + $0x44] sm:$0xf]  ;;  %v429_v23 = vld [vmem:[%s821_s0 + $0x48] sm:$0xf0]  ;;  %v428_v25 = vor.u32 %v530_v19, %v427_v18  ;;  %v400_v26 = vor.u32 %v521_v20, %v397_v21  ;;  %v435_v30 = vld [vmem:[%s821_s0 + $0x50] sm:$0xf] }
   0xa   :  { %244 = vmatpush.bf16.msra.mxu0 %v542_v4  ;;  %555 = vmatpush.bf16.msra.mxu2 %v542_v4  ;;  %v432_v27 = vor.u32 %v529_v22, %v429_v23  ;;  %v532_v31 = vld [vmem:[%s821_s0 + $0x54] sm:$0xf0]  ;;  %v523_v32 = vld [vmem:[%s821_s0 + $0x14] sm:$0xf]  ;;  %v405_v33 = vld [vmem:[%s821_s0 + $0x18] sm:$0xf0] }
   0xb   :  { %293 = vmatpush.bf16.msra.mxu1 %v550_v5  ;;  %563 = vmatpush.bf16.msra.mxu3 %v550_v5  ;;  %v531_v34 = vld [vmem:[%s821_s0 + $0x54] sm:$0xf]  ;;  %v437_v35 = vld [vmem:[%s821_s0 + $0x58] sm:$0xf0]  ;;  %v436_v37 = vor.u32 %v532_v31, %v435_v30  ;;  %v408_v38 = vor.u32 %v523_v32, %v405_v33  ;;  %v411_v40 = vld [vmem:[%s821_s0 + $0x20] sm:$0xf] }
   0xc   :  { %v440_v39 = vor.u32 %v531_v34, %v437_v35  ;;  %v526_v41 = vld [vmem:[%s821_s0 + $0x24] sm:$0xf0]  ;;  %v443_v42 = vld [vmem:[%s821_s0 + $0x60] sm:$0xf]  ;;  %v525_v44 = vld [vmem:[%s821_s0 + $0x24] sm:$0xf] }
   0xd   :  { %v534_v43 = vld [vmem:[%s821_s0 + $0x64] sm:$0xf0]  ;;  %v413_v45 = vld [vmem:[%s821_s0 + $0x28] sm:$0xf0]  ;;  %v533_v46 = vld [vmem:[%s821_s0 + $0x64] sm:$0xf]  ;;  %v412_v48 = vor.u32 %v526_v41, %v411_v40 }
   0xe   :  { %245 = vmatpush.bf16.msra.mxu0 %v541_v6  ;;  %556 = vmatpush.bf16.msra.mxu2 %v541_v6  ;;  %v445_v47 = vld [vmem:[%s821_s0 + $0x68] sm:$0xf0]  ;;  %v444_v49 = vor.u32 %v534_v43, %v443_v42  ;;  %v416_v50 = vor.u32 %v525_v44, %v413_v45  ;;  %v419_v52 = vld [vmem:[%s821_s0 + $0x30] sm:$0xf]  ;;  %v528_v53 = vld [vmem:[%s821_s0 + $0x34] sm:$0xf0] }
   0xf   :  { %294 = vmatpush.bf16.msra.mxu1 %v549_v7  ;;  %564 = vmatpush.bf16.msra.mxu3 %v549_v7  ;;  %v448_v51 = vor.u32 %v533_v46, %v445_v47  ;;  %v451_v54 = vld [vmem:[%s821_s0 + $0x70] sm:$0xf]  ;;  %v536_v55 = vld [vmem:[%s821_s0 + $0x74] sm:$0xf0]  ;;  %v527_v56 = vld [vmem:[%s821_s0 + $0x34] sm:$0xf]  ;;  %v420_v60 = vor.u32 %v528_v53, %v419_v52 }
  0x10   :  { %v421_v57 = vld [vmem:[%s821_s0 + $0x38] sm:$0xf0]  ;;  %v535_v58 = vld [vmem:[%s821_s0 + $0x74] sm:$0xf]  ;;  %v452_v61 = vor.u32 %v536_v55, %v451_v54  ;;  %v737_v0 = vld [vmem:[%s820_s2] ss:$0 sm:$0xff] }
  0x11   :  { %v453_v59 = vld [vmem:[%s821_s0 + $0x78] sm:$0xf0]  ;;  %v424_v62 = vor.u32 %v527_v56, %v421_v57 }
  0x12   :  { %246 = vmatpush.bf16.msra.mxu0 %v540_v8  ;;  %557 = vmatpush.bf16.msra.mxu2 %v540_v8  ;;  %v456_v63 = vor.u32 %v535_v58, %v453_v59 }
  0x13   :  { %295 = vmatpush.bf16.msra.mxu1 %v548_v9  ;;  %565 = vmatpush.bf16.msra.mxu3 %v548_v9 }
  0x16   :  { %247 = vmatpush.bf16.msra.mxu0 %v539_v10  ;;  %558 = vmatpush.bf16.msra.mxu2 %v539_v10 }
  0x17   :  { %296 = vmatpush.bf16.msra.mxu1 %v547_v11  ;;  %566 = vmatpush.bf16.msra.mxu3 %v547_v11 }
  0x1a   :  { %248 = vmatpush.bf16.msra.mxu0 %v538_v12  ;;  %559 = vmatpush.bf16.msra.mxu2 %v538_v12 }
  0x1b   :  { %297 = vmatpush.bf16.msra.mxu1 %v546_v13  ;;  %567 = vmatpush.bf16.msra.mxu3 %v546_v13 }
  0x1e   :  { %249 = vmatpush.bf16.msra.mxu0 %v537_v14  ;;  %560 = vmatpush.bf16.msra.mxu2 %v537_v14 }
  0x1f   :  { %298 = vmatpush.bf16.msra.mxu1 %v545_v15  ;;  %568 = vmatpush.bf16.msra.mxu3 %v545_v15 }
  0x21   :  { %250 = vmatmul.bf16.vlgmr.msra.gmra.mxu0 %v396_v24  ;;  %270 = vmatmul.bf16.vlgmr.msra.gmra.mxu2 %v428_v25 }
  0x22   :  { %299 = vmatmul.bf16.vlgmr.msra.gmra.mxu1 %v400_v26  ;;  %319 = vmatmul.bf16.vlgmr.msra.gmra.mxu3 %v432_v27 }
  0x31   :  { %255 = vmatmul.bf16.gmra.mxu0 %v404_v36  ;;  %275 = vmatmul.bf16.gmra.mxu2 %v436_v37 }
  0x32   :  { %304 = vmatmul.bf16.gmra.mxu1 %v408_v38  ;;  %324 = vmatmul.bf16.gmra.mxu3 %v440_v39 }
  0x41   :  { %260 = vmatmul.bf16.gmra.mxu0 %v412_v48  ;;  %280 = vmatmul.bf16.gmra.mxu2 %v444_v49 }
  0x42   :  { %309 = vmatmul.bf16.gmra.mxu1 %v416_v50  ;;  %329 = vmatmul.bf16.gmra.mxu3 %v448_v51 }
  0x51   :  { %265 = vmatmul.bf16.gmra.mxu0 %v420_v60  ;;  %285 = vmatmul.bf16.gmra.mxu2 %v452_v61 }
  0x52   :  { %314 = vmatmul.bf16.gmra.mxu1 %v424_v62  ;;  %334 = vmatmul.bf16.gmra.mxu3 %v456_v63 }
  0x9e   :  { %v251_v1 = vpop.f32.mrf.mxu0 }
  0x9f   :  { %v252_v2 = vadd.f32 %v737_v0, %v251_v1  ;;  %v300_v3 = vpop.f32.mrf.mxu1 }
  0xa1   :  { %v301_v4 = vadd.f32 %v300_v3, %v252_v2 }
  0xa3   :  { %v340_v5 = vmax.f32 %v301_v4, 0.0 }
  0xa4   :  { %v271_v6 = vpop.f32.mrf.mxu2 }
  0xa5   :  { %v356_v7 = vpack.c.bf16 %v340_v5, %v340_v5  ;;  %v272_v8 = vadd.f32 %v737_v0, %v271_v6  ;;  %v320_v9 = vpop.f32.mrf.mxu3 }
  0xa6   :  { %v253_v10 = vpop.f32.mrf.mxu0 }
  0xa7   :  { %373 = vst.msk [vmem:[%s822_s3] sm:$0xf] %vm372_vm0, %v356_v7  ;;  %v321_v11 = vadd.f32 %v320_v9, %v272_v8  ;;  %v254_v12 = vadd.f32 %v737_v0, %v253_v10  ;;  %v302_v13 = vpop.f32.mrf.mxu1 }
  0xa9   :  { %v348_v14 = vmax.f32 %v321_v11, 0.0  ;;  %v303_v15 = vadd.f32 %v302_v13, %v254_v12 }
  0xab   :  { %v364_v16 = vpack.c.bf16 %v348_v14, %v348_v14  ;;  %v341_v17 = vmax.f32 %v303_v15, 0.0 }
  0xac   :  { %v273_v18 = vpop.f32.mrf.mxu2 }
  0xad   :  { %381 = vst.msk [vmem:[%s822_s3 + $0x20] sm:$0xf] %vm372_vm0, %v364_v16  ;;  %v357_v19 = vpack.c.bf16 %v341_v17, %v341_v17  ;;  %v274_v20 = vadd.f32 %v737_v0, %v273_v18  ;;  %v322_v21 = vpop.f32.mrf.mxu3 }
  0xae   :  { %v256_v22 = vpop.f32.mrf.mxu0 }
  0xaf   :  { %374 = vst.msk [vmem:[%s822_s3 + $0x4] sm:$0xf] %vm372_vm0, %v357_v19  ;;  %v323_v23 = vadd.f32 %v322_v21, %v274_v20  ;;  %v257_v24 = vadd.f32 %v737_v0, %v256_v22  ;;  %v305_v25 = vpop.f32.mrf.mxu1 }
  0xb1   :  { %v349_v26 = vmax.f32 %v323_v23, 0.0  ;;  %v306_v27 = vadd.f32 %v305_v25, %v257_v24 }
  0xb3   :  { %v365_v28 = vpack.c.bf16 %v349_v26, %v349_v26  ;;  %v342_v29 = vmax.f32 %v306_v27, 0.0 }
  0xb4   :  { %v276_v30 = vpop.f32.mrf.mxu2 }
  0xb5   :  { %382 = vst.msk [vmem:[%s822_s3 + $0x24] sm:$0xf] %vm372_vm0, %v365_v28  ;;  %v358_v31 = vpack.c.bf16 %v342_v29, %v342_v29  ;;  %v277_v32 = vadd.f32 %v737_v0, %v276_v30  ;;  %v325_v33 = vpop.f32.mrf.mxu3 }
  0xb6   :  { %v258_v34 = vpop.f32.mrf.mxu0 }
  0xb7   :  { %375 = vst.msk [vmem:[%s822_s3 + $0x8] sm:$0xf] %vm372_vm0, %v358_v31  ;;  %v326_v35 = vadd.f32 %v325_v33, %v277_v32  ;;  %v259_v36 = vadd.f32 %v737_v0, %v258_v34  ;;  %v307_v37 = vpop.f32.mrf.mxu1 }
  0xb9   :  { %v350_v38 = vmax.f32 %v326_v35, 0.0  ;;  %v308_v39 = vadd.f32 %v307_v37, %v259_v36 }
  0xbb   :  { %v366_v40 = vpack.c.bf16 %v350_v38, %v350_v38  ;;  %v343_v41 = vmax.f32 %v308_v39, 0.0 }
  0xbc   :  { %v278_v42 = vpop.f32.mrf.mxu2 }
  0xbd   :  { %383 = vst.msk [vmem:[%s822_s3 + $0x28] sm:$0xf] %vm372_vm0, %v366_v40  ;;  %v359_v43 = vpack.c.bf16 %v343_v41, %v343_v41  ;;  %v279_v44 = vadd.f32 %v737_v0, %v278_v42  ;;  %v327_v45 = vpop.f32.mrf.mxu3 }
  0xbe   :  { %v261_v46 = vpop.f32.mrf.mxu0 }
  0xbf   :  { %376 = vst.msk [vmem:[%s822_s3 + $0xc] sm:$0xf] %vm372_vm0, %v359_v43  ;;  %v328_v47 = vadd.f32 %v327_v45, %v279_v44  ;;  %v262_v48 = vadd.f32 %v737_v0, %v261_v46  ;;  %v310_v49 = vpop.f32.mrf.mxu1 }
  0xc1   :  { %v351_v50 = vmax.f32 %v328_v47, 0.0  ;;  %v311_v51 = vadd.f32 %v310_v49, %v262_v48 }
  0xc3   :  { %v367_v52 = vpack.c.bf16 %v351_v50, %v351_v50  ;;  %v344_v53 = vmax.f32 %v311_v51, 0.0 }
  0xc4   :  { %v281_v54 = vpop.f32.mrf.mxu2 }
  0xc5   :  { %384 = vst.msk [vmem:[%s822_s3 + $0x2c] sm:$0xf] %vm372_vm0, %v367_v52  ;;  %v360_v55 = vpack.c.bf16 %v344_v53, %v344_v53  ;;  %v282_v56 = vadd.f32 %v737_v0, %v281_v54  ;;  %v330_v57 = vpop.f32.mrf.mxu3 }
  0xc6   :  { %v263_v58 = vpop.f32.mrf.mxu0 }
  0xc7   :  { %377 = vst.msk [vmem:[%s822_s3 + $0x10] sm:$0xf] %vm372_vm0, %v360_v55  ;;  %v331_v59 = vadd.f32 %v330_v57, %v282_v56  ;;  %v264_v60 = vadd.f32 %v737_v0, %v263_v58  ;;  %v312_v61 = vpop.f32.mrf.mxu1 }
  0xc9   :  { %v352_v62 = vmax.f32 %v331_v59, 0.0  ;;  %v313_v63 = vadd.f32 %v312_v61, %v264_v60 }
  0xcb   :  { %v368_v1 = vpack.c.bf16 %v352_v62, %v352_v62  ;;  %v345_v2 = vmax.f32 %v313_v63, 0.0 }
  0xcc   :  { %v283_v3 = vpop.f32.mrf.mxu2 }
  0xcd   :  { %385 = vst.msk [vmem:[%s822_s3 + $0x30] sm:$0xf] %vm372_vm0, %v368_v1  ;;  %v361_v4 = vpack.c.bf16 %v345_v2, %v345_v2  ;;  %v284_v5 = vadd.f32 %v737_v0, %v283_v3  ;;  %v332_v6 = vpop.f32.mrf.mxu3 }
  0xce   :  { %v266_v7 = vpop.f32.mrf.mxu0 }
  0xcf   :  { %378 = vst.msk [vmem:[%s822_s3 + $0x14] sm:$0xf] %vm372_vm0, %v361_v4  ;;  %v333_v8 = vadd.f32 %v332_v6, %v284_v5  ;;  %v267_v9 = vadd.f32 %v737_v0, %v266_v7  ;;  %v315_v10 = vpop.f32.mrf.mxu1 }
  0xd1   :  { %v353_v11 = vmax.f32 %v333_v8, 0.0  ;;  %v316_v12 = vadd.f32 %v315_v10, %v267_v9 }
  0xd3   :  { %v369_v13 = vpack.c.bf16 %v353_v11, %v353_v11  ;;  %v346_v14 = vmax.f32 %v316_v12, 0.0 }
  0xd4   :  { %v286_v15 = vpop.f32.mrf.mxu2 }
  0xd5   :  { %386 = vst.msk [vmem:[%s822_s3 + $0x34] sm:$0xf] %vm372_vm0, %v369_v13  ;;  %v362_v16 = vpack.c.bf16 %v346_v14, %v346_v14  ;;  %v287_v17 = vadd.f32 %v737_v0, %v286_v15  ;;  %v335_v18 = vpop.f32.mrf.mxu3 }
  0xd6   :  { %v268_v19 = vpop.f32.mrf.mxu0 }
  0xd7   :  { %379 = vst.msk [vmem:[%s822_s3 + $0x18] sm:$0xf] %vm372_vm0, %v362_v16  ;;  %v336_v20 = vadd.f32 %v335_v18, %v287_v17  ;;  %v269_v21 = vadd.f32 %v737_v0, %v268_v19  ;;  %v317_v22 = vpop.f32.mrf.mxu1 }
  0xd9   :  { %v354_v23 = vmax.f32 %v336_v20, 0.0  ;;  %v318_v24 = vadd.f32 %v317_v22, %v269_v21 }
  0xdb   :  { %v370_v25 = vpack.c.bf16 %v354_v23, %v354_v23  ;;  %v347_v26 = vmax.f32 %v318_v24, 0.0 }
  0xdc   :  { %v288_v27 = vpop.f32.mrf.mxu2 }
  0xdd   :  { %387 = vst.msk [vmem:[%s822_s3 + $0x38] sm:$0xf] %vm372_vm0, %v370_v25  ;;  %v363_v28 = vpack.c.bf16 %v347_v26, %v347_v26  ;;  %v289_v29 = vadd.f32 %v737_v0, %v288_v27  ;;  %v337_v30 = vpop.f32.mrf.mxu3 }
  0xdf   :  { %380 = vst.msk [vmem:[%s822_s3 + $0x1c] sm:$0xf] %vm372_vm0, %v363_v28  ;;  %v338_v31 = vadd.f32 %v337_v30, %v289_v29 }
  0xe1   :  { %v355_v32 = vmax.f32 %v338_v31, 0.0 }
  0xe3   :  { %v371_v33 = vpack.c.bf16 %v355_v32, %v355_v32 }
  0xe5   :  { %388 = vst.msk [vmem:[%s822_s3 + $0x3c] sm:$0xf] %vm372_vm0, %v371_v33 }

// kernel: conv_v2_forward.4
= control target key start
LH: loop header
LB: loop body
LE: loop exit
PB: predicated region body
PF: predicated region fallthrough
CT: control target
= control target key end

     0   :  { %vm392_vm0 = vcmask 519168   ;;  %s742_s1 = inlined_call_operand.vmem [shape: bf16[512,64], index: 1, kind: input, shape index: {}]   ;;  %s743_s2 = inlined_call_operand.vmem [shape: f32[1,64], index: 2, kind: input, shape index: {}]   ;;  %s744_s0 = inlined_call_operand.vmem [shape: bf16[24,512], index: 0, kind: input, shape index: {}]   ;;  %s745_s3 = inlined_call_operand.vmem [shape: bf16[24,64], index: 3, kind: output, shape index: {}]  }
   0x1   :  { %v555_v0 = vld [vmem:[%s742_s1 + $0x38] sm:$0xff]  ;;  %v554_v4 = vld [vmem:[%s742_s1 + $0x30] sm:$0xff]  ;;  %v553_v8 = vld [vmem:[%s742_s1 + $0x28] sm:$0xff] }
   0x2   :  { %v563_v1 = vld [vmem:[%s742_s1 + $0x78] sm:$0xff]  ;;  %314 = vmatpush.bf16.msra.mxu0 %v555_v0  ;;  %v562_v5 = vld [vmem:[%s742_s1 + $0x70] sm:$0xff]  ;;  %v561_v9 = vld [vmem:[%s742_s1 + $0x68] sm:$0xff] }
   0x3   :  { %v571_v2 = vld [vmem:[%s742_s1 + $0xb8] sm:$0xff]  ;;  %332 = vmatpush.bf16.msra.mxu1 %v563_v1  ;;  %v570_v6 = vld [vmem:[%s742_s1 + $0xb0] sm:$0xff]  ;;  %v569_v10 = vld [vmem:[%s742_s1 + $0xa8] sm:$0xff] }
   0x4   :  { %v579_v3 = vld [vmem:[%s742_s1 + $0xf8] sm:$0xff]  ;;  %350 = vmatpush.bf16.msra.mxu2 %v571_v2  ;;  %v578_v7 = vld [vmem:[%s742_s1 + $0xf0] sm:$0xff]  ;;  %v577_v11 = vld [vmem:[%s742_s1 + $0xe8] sm:$0xff] }
   0x5   :  { %368 = vmatpush.bf16.msra.mxu3 %v579_v3  ;;  %v552_v12 = vld [vmem:[%s742_s1 + $0x20] sm:$0xff]  ;;  %v551_v16 = vld [vmem:[%s742_s1 + $0x18] sm:$0xff]  ;;  %v550_v20 = vld [vmem:[%s742_s1 + $0x10] sm:$0xff] }
   0x6   :  { %315 = vmatpush.bf16.msra.mxu0 %v554_v4  ;;  %v560_v13 = vld [vmem:[%s742_s1 + $0x60] sm:$0xff]  ;;  %v559_v17 = vld [vmem:[%s742_s1 + $0x58] sm:$0xff]  ;;  %v558_v21 = vld [vmem:[%s742_s1 + $0x50] sm:$0xff] }
   0x7   :  { %333 = vmatpush.bf16.msra.mxu1 %v562_v5  ;;  %v568_v14 = vld [vmem:[%s742_s1 + $0xa0] sm:$0xff]  ;;  %v567_v18 = vld [vmem:[%s742_s1 + $0x98] sm:$0xff]  ;;  %v566_v22 = vld [vmem:[%s742_s1 + $0x90] sm:$0xff] }
   0x8   :  { %351 = vmatpush.bf16.msra.mxu2 %v570_v6  ;;  %v576_v15 = vld [vmem:[%s742_s1 + $0xe0] sm:$0xff]  ;;  %v575_v19 = vld [vmem:[%s742_s1 + $0xd8] sm:$0xff]  ;;  %v574_v23 = vld [vmem:[%s742_s1 + $0xd0] sm:$0xff] }
   0x9   :  { %369 = vmatpush.bf16.msra.mxu3 %v578_v7  ;;  %v549_v24 = vld [vmem:[%s742_s1 + $0x8] sm:$0xff]  ;;  %v548_v28 = vld [vmem:[%s742_s1] sm:$0xff]  ;;  %v546_v33 = vld [vmem:[%s744_s0 + $0xc] sm:$0xf0] }
   0xa   :  { %316 = vmatpush.bf16.msra.mxu0 %v553_v8  ;;  %v557_v25 = vld [vmem:[%s742_s1 + $0x48] sm:$0xff]  ;;  %v556_v29 = vld [vmem:[%s742_s1 + $0x40] sm:$0xff]  ;;  %v404_v35 = vld [vmem:[%s744_s0 + $0x10] sm:$0xf0] }
   0xb   :  { %334 = vmatpush.bf16.msra.mxu1 %v561_v9  ;;  %v565_v26 = vld [vmem:[%s742_s1 + $0x88] sm:$0xff]  ;;  %v564_v30 = vld [vmem:[%s742_s1 + $0x80] sm:$0xff]  ;;  %v547_v37 = vld [vmem:[%s744_s0 + $0x14] sm:$0xf0] }
   0xc   :  { %352 = vmatpush.bf16.msra.mxu2 %v569_v10  ;;  %v573_v27 = vld [vmem:[%s742_s1 + $0xc8] sm:$0xff]  ;;  %v572_v31 = vld [vmem:[%s742_s1 + $0xc0] sm:$0xff]  ;;  %v412_v39 = vld [vmem:[%s744_s0 + $0x18] sm:$0xf0] }
   0xd   :  { %370 = vmatpush.bf16.msra.mxu3 %v577_v11  ;;  %v402_v32 = vld [vmem:[%s744_s0] sm:$0xf]  ;;  %v544_v34 = vld [vmem:[%s744_s0 + $0x4] sm:$0xf]  ;;  %v410_v36 = vld [vmem:[%s744_s0 + $0x8] sm:$0xf] }
   0xe   :  { %317 = vmatpush.bf16.msra.mxu0 %v552_v12  ;;  %v545_v38 = vld [vmem:[%s744_s0 + $0xc] sm:$0xf]  ;;  %v403_v40 = vor.u32 %v546_v33, %v402_v32  ;;  %v407_v41 = vor.u32 %v544_v34, %v404_v35  ;;  %v411_v42 = vor.u32 %v547_v37, %v410_v36  ;;  %v18_v44 = vld [vmem:[%s744_s0 + $0x20] sm:$0xff] }
   0xf   :  { %335 = vmatpush.bf16.msra.mxu1 %v560_v13  ;;  %v415_v43 = vor.u32 %v545_v38, %v412_v39  ;;  %v19_v45 = vld [vmem:[%s744_s0 + $0x28] sm:$0xff]  ;;  %v102_v46 = vunpack.c.l.b16 %v18_v44  ;;  %v103_v47 = vunpack.c.h.b16 %v18_v44  ;;  %v580_v54 = vld [vmem:[%s743_s2] ss:$0 sm:$0xff] }
  0x10   :  { %353 = vmatpush.bf16.msra.mxu2 %v568_v14  ;;  %v104_v48 = vunpack.c.l.b16 %v19_v45  ;;  %v105_v49 = vunpack.c.h.b16 %v19_v45 }
  0x11   :  { %371 = vmatpush.bf16.msra.mxu3 %v576_v15  ;;  %v110_v50 = vpack.c.b16 %v102_v46, %v102_v46  ;;  %v111_v51 = vpack.c.b16 %v103_v47, %v103_v47 }
  0x12   :  { %318 = vmatpush.bf16.msra.mxu0 %v551_v16  ;;  %v112_v52 = vpack.c.b16 %v104_v48, %v104_v48  ;;  %v113_v53 = vpack.c.b16 %v105_v49, %v105_v49 }
  0x13   :  { %336 = vmatpush.bf16.msra.mxu1 %v559_v17 }
  0x14   :  { %354 = vmatpush.bf16.msra.mxu2 %v567_v18 }
  0x15   :  { %372 = vmatpush.bf16.msra.mxu3 %v575_v19 }
  0x16   :  { %319 = vmatpush.bf16.msra.mxu0 %v550_v20 }
  0x17   :  { %337 = vmatpush.bf16.msra.mxu1 %v558_v21 }
  0x18   :  { %355 = vmatpush.bf16.msra.mxu2 %v566_v22 }
  0x19   :  { %373 = vmatpush.bf16.msra.mxu3 %v574_v23 }
  0x1a   :  { %320 = vmatpush.bf16.msra.mxu0 %v549_v24 }
  0x1b   :  { %338 = vmatpush.bf16.msra.mxu1 %v557_v25 }
  0x1c   :  { %356 = vmatpush.bf16.msra.mxu2 %v565_v26 }
  0x1d   :  { %374 = vmatpush.bf16.msra.mxu3 %v573_v27 }
  0x1e   :  { %321 = vmatpush.bf16.msra.mxu0 %v548_v28 }
  0x1f   :  { %339 = vmatpush.bf16.msra.mxu1 %v556_v29 }
  0x20   :  { %357 = vmatpush.bf16.msra.mxu2 %v564_v30 }
  0x21   :  { %375 = vmatpush.bf16.msra.mxu3 %v572_v31  ;;  %322 = vmatmul.bf16.vlgmr.msra.gmra.mxu0 %v403_v40 }
  0x22   :  { %340 = vmatmul.bf16.vlgmr.msra.gmra.mxu1 %v407_v41 }
  0x23   :  { %358 = vmatmul.bf16.vlgmr.msra.gmra.mxu2 %v411_v42 }
  0x24   :  { %376 = vmatmul.bf16.vlgmr.msra.gmra.mxu3 %v415_v43 }
  0x31   :  { %327 = vmatmul.bf16.gmra.mxu0 %v110_v50 }
  0x32   :  { %345 = vmatmul.bf16.gmra.mxu1 %v111_v51 }
  0x33   :  { %363 = vmatmul.bf16.gmra.mxu2 %v112_v52 }
  0x34   :  { %381 = vmatmul.bf16.gmra.mxu3 %v113_v53 }
  0x9e   :  { %v323_v55 = vpop.f32.mrf.mxu0 }
  0x9f   :  { %v341_v56 = vpop.f32.mrf.mxu1  ;;  %v324_v57 = vadd.f32 %v580_v54, %v323_v55 }
  0xa1   :  { %v342_v58 = vadd.f32 %v341_v56, %v324_v57 }
  0xa6   :  { %v359_v59 = vpop.f32.mrf.mxu2  ;;  %v325_v62 = vpop.f32.mrf.mxu0 }
  0xa7   :  { %v377_v60 = vpop.f32.mrf.mxu3  ;;  %v360_v61 = vadd.f32 %v359_v59, %v342_v58  ;;  %v343_v63 = vpop.f32.mrf.mxu1  ;;  %v326_v1 = vadd.f32 %v580_v54, %v325_v62 }
  0xa9   :  { %v378_v0 = vadd.f32 %v377_v60, %v360_v61  ;;  %v344_v4 = vadd.f32 %v343_v63, %v326_v1 }
  0xab   :  { %v386_v2 = vmax.f32 %v378_v0, 0.0 }
  0xad   :  { %v389_v3 = vpack.c.bf16 %v386_v2, %v386_v2 }
  0xae   :  { %v361_v5 = vpop.f32.mrf.mxu2  ;;  %v328_v8 = vpop.f32.mrf.mxu0 }
  0xaf   :  { %v379_v6 = vpop.f32.mrf.mxu3  ;;  %393 = vst.msk [vmem:[%s745_s3] sm:$0xf] %vm392_vm0, %v389_v3  ;;  %v362_v7 = vadd.f32 %v361_v5, %v344_v4  ;;  %v346_v9 = vpop.f32.mrf.mxu1  ;;  %v329_v10 = vadd.f32 %v580_v54, %v328_v8 }
  0xb1   :  { %v380_v11 = vadd.f32 %v379_v6, %v362_v7  ;;  %v347_v13 = vadd.f32 %v346_v9, %v329_v10 }
  0xb3   :  { %v387_v12 = vmax.f32 %v380_v11, 0.0 }
  0xb5   :  { %v390_v14 = vpack.c.bf16 %v387_v12, %v387_v12 }
  0xb6   :  { %v364_v15 = vpop.f32.mrf.mxu2  ;;  %v330_v18 = vpop.f32.mrf.mxu0 }
  0xb7   :  { %v382_v16 = vpop.f32.mrf.mxu3  ;;  %394 = vst.msk [vmem:[%s745_s3 + $0x4] sm:$0xf] %vm392_vm0, %v390_v14  ;;  %v365_v17 = vadd.f32 %v364_v15, %v347_v13  ;;  %v348_v19 = vpop.f32.mrf.mxu1 }
  0xb9   :  { %v383_v20 = vadd.f32 %v382_v16, %v365_v17 }
  0xbb   :  { %v388_v21 = vmax.f32 %v383_v20, 0.0 }
  0xbd   :  { %v391_v22 = vpack.c.bf16 %v388_v21, %v388_v21 }
  0xbe   :  { %v366_v23 = vpop.f32.mrf.mxu2 }
  0xbf   :  { %v384_v24 = vpop.f32.mrf.mxu3  ;;  %395 = vst.msk [vmem:[%s745_s3 + $0x8] sm:$0xf] %vm392_vm0, %v391_v22 }

// kernel: conv_v2_forward.5
= control target key start
LH: loop header
LB: loop body
LE: loop exit
PB: predicated region body
PF: predicated region fallthrough
CT: control target
= control target key end

     0   :  { %vm341_vm0 = vcmask 523264   ;;  %vm601_vm1 = vcmask 7168   ;;  %s1147_s1 = inlined_call_operand.vmem [shape: bf16[576,64], index: 1, kind: input, shape index: {}]   ;;  %s1148_s2 = inlined_call_operand.vmem [shape: f32[1,64], index: 2, kind: input, shape index: {}]   ;;  %s1149_s0 = inlined_call_operand.vmem [shape: bf16[8,576], index: 0, kind: input, shape index: {}]   ;;  %s1150_s3 = inlined_call_operand.vmem [shape: bf16[64,512], index: 3, kind: input, shape index: {}]   ;;  %s1151_s6 = inlined_call_operand.<no memory space> [shape: f32[1,1], index: 6, kind: input, shape index: {}]   ;;  %s1152_s4 = inlined_call_operand.vmem [shape: f32[1,512], index: 4, kind: input, shape index: {}]   ;;  %s1153_s5 = inlined_call_operand.vmem [shape: f32[1,512], index: 5, kind: input, shape index: {}]   ;;  %s1154_s7 = inlined_call_operand.vmem [shape: f32[8,1], index: 7, kind: output, shape index: {}]  }
   0x1   :  { %v827_v0 = vld [vmem:[%s1147_s1 + $0x38] sm:$0xff]  ;;  %v826_v4 = vld [vmem:[%s1147_s1 + $0x30] sm:$0xff]  ;;  %v825_v8 = vld [vmem:[%s1147_s1 + $0x28] sm:$0xff] }
   0x2   :  { %v843_v1 = vld [vmem:[%s1147_s1 + $0xb8] sm:$0xff]  ;;  %345 = vmatpush.bf16.msra.mxu0 %v827_v0  ;;  %v842_v5 = vld [vmem:[%s1147_s1 + $0xb0] sm:$0xff]  ;;  %v841_v9 = vld [vmem:[%s1147_s1 + $0xa8] sm:$0xff] }
   0x3   :  { %v851_v2 = vld [vmem:[%s1147_s1 + $0xf8] sm:$0xff]  ;;  %371 = vmatpush.bf16.msra.mxu2 %v843_v1  ;;  %v850_v6 = vld [vmem:[%s1147_s1 + $0xf0] sm:$0xff]  ;;  %v849_v10 = vld [vmem:[%s1147_s1 + $0xe8] sm:$0xff] }
   0x4   :  { %v835_v3 = vld [vmem:[%s1147_s1 + $0x78] sm:$0xff]  ;;  %384 = vmatpush.bf16.msra.mxu3 %v851_v2  ;;  %v834_v7 = vld [vmem:[%s1147_s1 + $0x70] sm:$0xff]  ;;  %v833_v11 = vld [vmem:[%s1147_s1 + $0x68] sm:$0xff] }
   0x5   :  { %358 = vmatpush.bf16.msra.mxu1 %v835_v3  ;;  %v824_v12 = vld [vmem:[%s1147_s1 + $0x20] sm:$0xff]  ;;  %v823_v16 = vld [vmem:[%s1147_s1 + $0x18] sm:$0xff]  ;;  %v822_v20 = vld [vmem:[%s1147_s1 + $0x10] sm:$0xff] }
   0x6   :  { %346 = vmatpush.bf16.msra.mxu0 %v826_v4  ;;  %v840_v13 = vld [vmem:[%s1147_s1 + $0xa0] sm:$0xff]  ;;  %v839_v17 = vld [vmem:[%s1147_s1 + $0x98] sm:$0xff]  ;;  %v838_v21 = vld [vmem:[%s1147_s1 + $0x90] sm:$0xff] }
   0x7   :  { %372 = vmatpush.bf16.msra.mxu2 %v842_v5  ;;  %v848_v14 = vld [vmem:[%s1147_s1 + $0xe0] sm:$0xff]  ;;  %v847_v18 = vld [vmem:[%s1147_s1 + $0xd8] sm:$0xff]  ;;  %v846_v22 = vld [vmem:[%s1147_s1 + $0xd0] sm:$0xff] }
   0x8   :  { %385 = vmatpush.bf16.msra.mxu3 %v850_v6  ;;  %v832_v15 = vld [vmem:[%s1147_s1 + $0x60] sm:$0xff]  ;;  %v831_v19 = vld [vmem:[%s1147_s1 + $0x58] sm:$0xff]  ;;  %v830_v23 = vld [vmem:[%s1147_s1 + $0x50] sm:$0xff] }
   0x9   :  { %359 = vmatpush.bf16.msra.mxu1 %v834_v7  ;;  %v821_v24 = vld [vmem:[%s1147_s1 + $0x8] sm:$0xff]  ;;  %v29_v26 = vld [vmem:[%s1149_s0] sm:$0xff]  ;;  %v855_v38 = vld [vmem:[%s1147_s1 + $0x118] sm:$0xff] }
   0xa   :  { %347 = vmatpush.bf16.msra.mxu0 %v825_v8  ;;  %v837_v25 = vld [vmem:[%s1147_s1 + $0x88] sm:$0xff]  ;;  %v111_v30 = vunpack.c.l.b16 %v29_v26  ;;  %v820_v32 = vld [vmem:[%s1147_s1] sm:$0xff]  ;;  %v112_v35 = vunpack.c.h.b16 %v29_v26  ;;  %v854_v43 = vld [vmem:[%s1147_s1 + $0x110] sm:$0xff] }
   0xb   :  { %373 = vmatpush.bf16.msra.mxu2 %v841_v9  ;;  %v30_v27 = vld [vmem:[%s1149_s0 + $0x8] sm:$0xff]  ;;  %v836_v33 = vld [vmem:[%s1147_s1 + $0x80] sm:$0xff]  ;;  %v31_v45 = vld [vmem:[%s1149_s0 + $0x10] sm:$0xf] }
   0xc   :  { %386 = vmatpush.bf16.msra.mxu3 %v849_v10  ;;  %v845_v28 = vld [vmem:[%s1147_s1 + $0xc8] sm:$0xff]  ;;  %v113_v31 = vunpack.c.l.b16 %v30_v27  ;;  %v114_v34 = vunpack.c.h.b16 %v30_v27  ;;  %v844_v36 = vld [vmem:[%s1147_s1 + $0xc0] sm:$0xff]  ;;  %v116_v39 = vpack.c.b16 %v111_v30, %v111_v30  ;;  %v117_v42 = vpack.c.b16 %v112_v35, %v112_v35  ;;  %v804_v50 = vld [vmem:[%s1150_s3 + $0x70] sm:$0xf0] }
   0xd   :  { %360 = vmatpush.bf16.msra.mxu1 %v833_v11  ;;  %v829_v29 = vld [vmem:[%s1147_s1 + $0x48] sm:$0xff]  ;;  %v828_v37 = vld [vmem:[%s1147_s1 + $0x40] sm:$0xff]  ;;  %v115_v47 = vunpack.c.l.b16 %v31_v45  ;;  %v870_v53 = vld [vmem:[%s1150_s3 + $0x6c] sm:$0xf0] }
   0xe   :  { %348 = vmatpush.bf16.msra.mxu0 %v824_v12  ;;  %v118_v40 = vpack.c.b16 %v113_v31, %v113_v31  ;;  %v119_v41 = vpack.c.b16 %v114_v34, %v114_v34  ;;  %v853_v44 = vld [vmem:[%s1147_s1 + $0x108] sm:$0xff]  ;;  %v852_v46 = vld [vmem:[%s1147_s1 + $0x100] sm:$0xff]  ;;  %v871_v55 = vld [vmem:[%s1150_s3 + $0x74] sm:$0xf0] }
   0xf   :  { %374 = vmatpush.bf16.msra.mxu2 %v840_v13  ;;  %v120_v48 = vpack.c.b16 %v115_v47, %v115_v47  ;;  %v868_v49 = vld [vmem:[%s1150_s3 + $0x64] sm:$0xf]  ;;  %v802_v51 = vld [vmem:[%s1150_s3 + $0x60] sm:$0xf]  ;;  %v810_v54 = vld [vmem:[%s1150_s3 + $0x68] sm:$0xf] }
  0x10   :  { %387 = vmatpush.bf16.msra.mxu3 %v848_v14  ;;  %v807_v52 = vor.u32 %v868_v49, %v804_v50  ;;  %v803_v56 = vor.u32 %v870_v53, %v802_v51  ;;  %v811_v57 = vor.u32 %v871_v55, %v810_v54  ;;  %v869_v58 = vld [vmem:[%s1150_s3 + $0x6c] sm:$0xf]  ;;  %v812_v59 = vld [vmem:[%s1150_s3 + $0x78] sm:$0xf0]  ;;  %v864_v61 = vld [vmem:[%s1150_s3 + $0x44] sm:$0xf]  ;;  %v12_v51 = vstv %s1151_s6 }
  0x11   :  { %361 = vmatpush.bf16.msra.mxu1 %v832_v15  ;;  %v815_v60 = vor.u32 %v869_v58, %v812_v59  ;;  %v788_v62 = vld [vmem:[%s1150_s3 + $0x50] sm:$0xf0]  ;;  %v786_v63 = vld [vmem:[%s1150_s3 + $0x40] sm:$0xf]  ;;  %v866_v1 = vld [vmem:[%s1150_s3 + $0x4c] sm:$0xf0] }
  0x12   :  { %349 = vmatpush.bf16.msra.mxu0 %v823_v16  ;;  %v791_v0 = vor.u32 %v864_v61, %v788_v62  ;;  %v794_v2 = vld [vmem:[%s1150_s3 + $0x48] sm:$0xf]  ;;  %v867_v3 = vld [vmem:[%s1150_s3 + $0x54] sm:$0xf0]  ;;  %v787_v4 = vor.u32 %v866_v1, %v786_v63  ;;  %v865_v6 = vld [vmem:[%s1150_s3 + $0x4c] sm:$0xf] }
  0x13   :  { %375 = vmatpush.bf16.msra.mxu2 %v839_v17  ;;  %v795_v5 = vor.u32 %v867_v3, %v794_v2  ;;  %v796_v7 = vld [vmem:[%s1150_s3 + $0x58] sm:$0xf0]  ;;  %v860_v9 = vld [vmem:[%s1150_s3 + $0x24] sm:$0xf]  ;;  %v772_v10 = vld [vmem:[%s1150_s3 + $0x30] sm:$0xf0] }
  0x14   :  { %388 = vmatpush.bf16.msra.mxu3 %v847_v18  ;;  %v799_v8 = vor.u32 %v865_v6, %v796_v7  ;;  %v770_v11 = vld [vmem:[%s1150_s3 + $0x20] sm:$0xf]  ;;  %v775_v12 = vor.u32 %v860_v9, %v772_v10  ;;  %v862_v13 = vld [vmem:[%s1150_s3 + $0x2c] sm:$0xf0]  ;;  %v778_v14 = vld [vmem:[%s1150_s3 + $0x28] sm:$0xf] }
  0x15   :  { %362 = vmatpush.bf16.msra.mxu1 %v831_v19  ;;  %v863_v15 = vld [vmem:[%s1150_s3 + $0x34] sm:$0xf0]  ;;  %v771_v16 = vor.u32 %v862_v13, %v770_v11  ;;  %v861_v18 = vld [vmem:[%s1150_s3 + $0x2c] sm:$0xf]  ;;  %v780_v19 = vld [vmem:[%s1150_s3 + $0x38] sm:$0xf0] }
  0x16   :  { %350 = vmatpush.bf16.msra.mxu0 %v822_v20  ;;  %v779_v17 = vor.u32 %v863_v15, %v778_v14  ;;  %v783_v20 = vor.u32 %v861_v18, %v780_v19  ;;  %v762_v26 = vld [vmem:[%s1150_s3 + $0x8] sm:$0xf]  ;;  %v859_v27 = vld [vmem:[%s1150_s3 + $0x14] sm:$0xf0]  ;;  %v857_v30 = vld [vmem:[%s1150_s3 + $0xc] sm:$0xf] }
  0x17   :  { %376 = vmatpush.bf16.msra.mxu2 %v838_v21  ;;  %v856_v21 = vld [vmem:[%s1150_s3 + $0x4] sm:$0xf]  ;;  %v764_v31 = vld [vmem:[%s1150_s3 + $0x18] sm:$0xf0]  ;;  %v872_v34 = vld [vmem:[%s1148_s2] ss:$0 sm:$0xff] }
  0x18   :  { %389 = vmatpush.bf16.msra.mxu3 %v846_v22  ;;  %v756_v22 = vld [vmem:[%s1150_s3 + $0x10] sm:$0xf0]  ;;  %13 = vst [vmem:[#allocation2] sm:$0x1] %v12_v51 }
  0x19   :  { %363 = vmatpush.bf16.msra.mxu1 %v830_v23  ;;  %v754_v23 = vld [vmem:[%s1150_s3] sm:$0xf] }
  0x1a   :  { %351 = vmatpush.bf16.msra.mxu0 %v821_v24  ;;  %v759_v24 = vor.u32 %v856_v21, %v756_v22 }
  0x1b   :  { %377 = vmatpush.bf16.msra.mxu2 %v837_v25  ;;  %v858_v25 = vld [vmem:[%s1150_s3 + $0xc] sm:$0xf0] }
  0x1c   :  { %390 = vmatpush.bf16.msra.mxu3 %v845_v28  ;;  %v755_v28 = vor.u32 %v858_v25, %v754_v23 }
  0x1d   :  { %364 = vmatpush.bf16.msra.mxu1 %v829_v29  ;;  %v763_v29 = vor.u32 %v859_v27, %v762_v26 }
  0x1e   :  { %352 = vmatpush.bf16.msra.mxu0 %v820_v32  ;;  %v767_v32 = vor.u32 %v857_v30, %v764_v31 }
  0x1f   :  { %378 = vmatpush.bf16.msra.mxu2 %v836_v33  ;;  %v873_v21 = vld [vmem:[#allocation2] ss:$0 sm:$0xff] }
  0x20   :  { %391 = vmatpush.bf16.msra.mxu3 %v844_v36 }
  0x21   :  { %365 = vmatpush.bf16.msra.mxu1 %v828_v37  ;;  %353 = vmatmul.bf16.vlgmr.msra.gmra.mxu0 %v116_v39 }
  0x22   :  { %401 = vmatpush.bf16.msrb.mxu0 %v855_v38  ;;  %379 = vmatmul.bf16.vlgmr.msra.gmra.mxu2 %v118_v40 }
  0x23   :  { %392 = vmatmul.bf16.vlgmr.msra.gmra.mxu3 %v119_v41  ;;  %538 = vmatpush.bf16.msrb.mxu2 %v807_v52  ;;  %v428_v52 = vld [vmem:[%s1152_s4] sm:$0xf] }
  0x24   :  { %366 = vmatmul.bf16.vlgmr.msra.gmra.mxu1 %v117_v42  ;;  %551 = vmatpush.bf16.msrb.mxu3 %v811_v57  ;;  %v430_v53 = vperm.slane %v428_v52, 0  ;;  %v577_v57 = vld [vmem:[%s1153_s5] sm:$0xf]  ;;  %v433_v58 = vperm.slane %v428_v52, 3  ;;  %v431_v59 = vperm.slane %v428_v52, 1 }
  0x25   :  { %525 = vmatpush.bf16.msrb.mxu1 %v803_v56  ;;  %v579_v61 = vperm.slane %v577_v57, 0  ;;  %v580_v2 = vperm.slane %v577_v57, 1  ;;  %v581_v7 = vperm.slane %v577_v57, 2  ;;  %v582_v13 = vperm.slane %v577_v57, 3 }
  0x26   :  { %402 = vmatpush.bf16.msrb.mxu0 %v854_v43 }
  0x27   :  { %539 = vmatpush.bf16.msrb.mxu2 %v791_v0 }
  0x28   :  { %552 = vmatpush.bf16.msrb.mxu3 %v795_v5 }
  0x29   :  { %526 = vmatpush.bf16.msrb.mxu1 %v787_v4 }
  0x2a   :  { %403 = vmatpush.bf16.msrb.mxu0 %v853_v44 }
  0x2b   :  { %540 = vmatpush.bf16.msrb.mxu2 %v775_v12 }
  0x2c   :  { %553 = vmatpush.bf16.msrb.mxu3 %v779_v17 }
  0x2d   :  { %527 = vmatpush.bf16.msrb.mxu1 %v771_v16 }
  0x2e   :  { %404 = vmatpush.bf16.msrb.mxu0 %v852_v46 }
  0x2f   :  { %541 = vmatpush.bf16.msrb.mxu2 %v759_v24 }
  0x30   :  { %554 = vmatpush.bf16.msrb.mxu3 %v763_v29 }
  0x31   :  { %751 = vmatmul.msk.bf16.vlgmr.msrb.gmra.mxu0 %vm341_vm0, %v120_v48  ;;  %528 = vmatpush.bf16.msrb.mxu1 %v755_v28 }
  0x32   :  { %564 = vmatpush.bf16.msra.mxu0 %v815_v60  ;;  %v432_v60 = vperm.slane %v428_v52, 2 }
  0x36   :  { %565 = vmatpush.bf16.msra.mxu0 %v799_v8 }
  0x3a   :  { %566 = vmatpush.bf16.msra.mxu0 %v783_v20 }
  0x3e   :  { %567 = vmatpush.bf16.msra.mxu0 %v767_v32 }
  0x9e   :  { %v354_v33 = vpop.f32.mrf.mxu0 }
  0x9f   :  { %v355_v36 = vadd.f32 %v872_v34, %v354_v33 }
  0xa1   :  { %v367_v35 = vpop.f32.mrf.mxu1 }
  0xa2   :  { %v368_v40 = vadd.f32 %v367_v35, %v355_v36 }
  0xa5   :  { %v380_v37 = vpop.f32.mrf.mxu2 }
  0xa6   :  { %v393_v38 = vpop.f32.mrf.mxu3  ;;  %v356_v39 = vpop.f32.mrf.mxu0  ;;  %v381_v42 = vadd.f32 %v380_v37, %v368_v40 }
  0xa8   :  { %v394_v44 = vadd.f32 %v393_v38, %v381_v42 }
  0xa9   :  { %v369_v41 = vpop.f32.mrf.mxu1 }
  0xad   :  { %v382_v43 = vpop.f32.mrf.mxu2 }
  0xae   :  { %v395_v45 = vpop.f32.mrf.mxu3  ;;  %v406_v46 = vpop.f32.mrf.mxu0 }
  0xaf   :  { %v407_v47 = vadd.f32 %v406_v46, %v394_v44 }
  0xb1   :  { %v410_v48 = vmax.f32 %v407_v47, 0.0 }
  0xb3   :  { %v411_v49 = vpack.c.bf16 %v410_v48, %v410_v48 }
  0xb5   :  { %816 = vmatmul.msk.bf16.vlgmr.msrb.gmra.mxu1 %vm341_vm0, %v411_v49  ;;  %817 = vmatmul.msk.bf16.vlgmr.msrb.gmra.mxu2 %vm341_vm0, %v411_v49 }
  0xb6   :  { %818 = vmatmul.msk.bf16.vlgmr.msrb.gmra.mxu3 %vm341_vm0, %v411_v49  ;;  %819 = vmatmul.msk.bf16.vlgmr.msra.gmra.mxu0 %vm341_vm0, %v411_v49  ;;  %v408_v50 = vpop.f32.mrf.mxu0 }
 0x132   :  { %v530_v54 = vpop.f32.mrf.mxu1 }
 0x133   :  { %v569_v55 = vpop.f32.mrf.mxu0  ;;  %v531_v56 = vadd.f32 %v530_v54, %v430_v53 }
 0x134   :  { %v570_v0 = vadd.f32 %v569_v55, %v433_v58 }
 0x135   :  { %v573_v63 = vmax.f32 %v531_v56, 0.0 }
 0x136   :  { %v576_v11 = vmax.f32 %v570_v0, 0.0 }
 0x137   :  { %v587_v10 = vmul.f32 %v579_v61, %v573_v63 }
 0x138   :  { %v543_v62 = vpop.f32.mrf.mxu2  ;;  %v590_v18 = vmul.f32 %v582_v13, %v576_v11 }
 0x139   :  { %v544_v1 = vadd.f32 %v543_v62, %v431_v59  ;;  %v556_v3 = vpop.f32.mrf.mxu3 }
 0x13a   :  { %v557_v4 = vadd.f32 %v556_v3, %v432_v60  ;;  %v532_v5 = vpop.f32.mrf.mxu1 }
 0x13b   :  { %v574_v6 = vmax.f32 %v544_v1, 0.0  ;;  %v571_v8 = vpop.f32.mrf.mxu0 }
 0x13c   :  { %v575_v9 = vmax.f32 %v557_v4, 0.0 }
 0x13d   :  { %v588_v12 = vmul.f32 %v580_v2, %v574_v6 }
 0x13e   :  { %v589_v14 = vmul.f32 %v581_v7, %v575_v9 }
 0x13f   :  { %v591_v15 = vadd.f32 %v588_v12, %v587_v10 }
 0x140   :  { %v545_v16 = vpop.f32.mrf.mxu2 }
 0x141   :  { %v558_v17 = vpop.f32.mrf.mxu3  ;;  %v592_v19 = vadd.f32 %v591_v15, %v589_v14 }
 0x143   :  { %v593_v20 = vadd.f32 %v592_v19, %v590_v18 }
 0x145   :  { %594 = vadd.xlane.f32.xlu0 %v593_v20 }
 0x1b8   :  { %v595_v22 = vpop.xlane.xlu0 %594 }
 0x1b9   :  { %v600_v23 = vadd.f32 %v873_v21, %v595_v22 }
 0x1bb   :  { %602 = vst.msk [vmem:[%s1154_s7] sm:$0xff] %vm601_vm1, %v600_v23 }

</bundles_post_ra>
